<compile_context>
chip_gen: v7x
topology: tpu7x:2x2x1
jax: 0.10.0
libtpu: 0.0.40
codegen_flags: <defaults>
</compile_context>

<pallas_src>
import functools

import jax
import jax.numpy as jnp
from jax.experimental import pallas as pl
from jax.experimental.pallas import tpu as pltpu


# ---------------------------------------------------------------------------
# pallas_call 1: dp[1] 1x1 conv, channel-major (no transposes, lane-dense h*w)
# ---------------------------------------------------------------------------
def _proj_conv_kernel(x_ref, w_ref, b_ref, y_ref, *, precise):
    # x_ref: (1, d, hw)  w_ref: (cproj, d)  b_ref: (cproj, 1)  y_ref: (1, cproj, hw)
    mxu_dt = jnp.float32 if precise else jnp.bfloat16
    acc = jnp.dot(w_ref[...].astype(mxu_dt), x_ref[0].astype(mxu_dt),
                  preferred_element_type=jnp.float32)
    y_ref[0] = (acc + b_ref[...]).astype(y_ref.dtype)


# ---------------------------------------------------------------------------
# pallas_call 2: matrix (row/column) attention + dp[2] residual + dp[3], fused
# ---------------------------------------------------------------------------
def _attn_kernel(ya_ref, yb_ref, tile_ref, rep_ref, psum_ref,
                 w2_ref, b2_ref, w3_ref, b3_ref, o_ref,
                 *, nh, kd, hd, h, w, scale, precise):
    # ya_ref  : (1, cproj, h*w)   projection output, lane-dense (p = ho*w + wo)
    # yb_ref  : (1, cproj*h, w)   same data, w-minor view (rows = (channel, ho))
    # tile_ref: (w, h*w)  0/1, tile_ref[wq, p] = (wo(p) == wq)   lane-tiling matrix
    # rep_ref : (h, h*w)  0/1, rep_ref[hq, p]  = (ho(p) == hq)   lane-repeat matrix
    # psum_ref: (hd, hd*h) 0/1, psum_ref[dv, a] = (a // h == dv) row-group-sum matrix
    # w2/w3   : (d, d)   b2/b3: (d, 1)   o_ref: (1, d, h*w)
    f32 = jnp.float32
    mxu_dt = f32 if precise else jnp.bfloat16
    hw = h * w
    cpg = 4 * kd + hd                       # channels per head group

    tile_mat = tile_ref[...].astype(mxu_dt)
    rep_mat = rep_ref[...].astype(mxu_dt)
    psum_mat = psum_ref[...].astype(mxu_dt)

    def softmax0(s):                        # softmax over axis 0, lanes stay dense
        m = jnp.max(s, axis=0, keepdims=True)
        e = jnp.exp(s - m)
        den = jnp.sum(e, axis=0, keepdims=True)
        if precise:
            return e / den
        return e * pl.reciprocal(den, approx=True)   # EUP slot -> ~free

    head_outs = []
    v_slabs = []
    for g in range(nh):
        ca = g * cpg                        # channel offset in view A
        cb = ca * h                         # row offset in view B

        rk = ya_ref[0, ca + kd:ca + 2 * kd, :]               # (kd, hw)   rk[d, (ho,wo)]
        ck = ya_ref[0, ca + 3 * kd:ca + 4 * kd, :]           # (kd, hw)   ck[d, (ho,wo)]
        v_slabs.append(ya_ref[0, ca + 4 * kd:ca + cpg, :])   # (hd, hw)

        # --- row attention: r[i, p=(ho,wo)] = softmax_i(scale * sum_d rq[d,i,wo]*rk[d,ho,wo])
        rq_rows = yb_ref[0, cb:cb + kd * h, :]               # (kd*h, w)   rq[d,i,wq]
        rq_rep = jnp.dot(rq_rows.astype(mxu_dt), tile_mat,
                         preferred_element_type=f32).reshape(kd, h, hw)
        s_r = jnp.sum(rq_rep * rk[:, None, :], axis=0) * scale        # (h, hw), lane-dense
        r = softmax0(s_r)

        # --- column attention: c[j, p=(ho,wo)] = softmax_j(scale * sum_d cq[d,ho,j]*ck[d,ho,wo])
        cq3 = yb_ref[0, cb + 2 * kd * h:cb + 3 * kd * h, :].reshape(kd, h, w)
        cqT = jnp.swapaxes(cq3, -1, -2)                      # (kd, w, h), in-kernel XLU transpose
        cq_rep = jnp.dot(cqT.reshape(kd * w, h).astype(mxu_dt), rep_mat,
                         preferred_element_type=f32).reshape(kd, w, hw)
        s_c = jnp.sum(cq_rep * ck[:, None, :], axis=0) * scale        # (w, hw), lane-dense
        c = softmax0(s_c)

        # --- bilinear mix, no materialized (h*w, h*w) matrix:
        #       T[(dv,i), p] = sum_j v[dv,i,j] * c[j,p]        (MXU, 256 rows streamed)
        #       out[dv, p]   = sum_i r[i,p] * T[(dv,i), p]     (VPU mult + group-sum matmul)
        v_rows = yb_ref[0, cb + 4 * kd * h:cb + cpg * h, :]  # (hd*h, w)   v[dv,i,j]
        t = jnp.dot(v_rows.astype(mxu_dt), c.astype(mxu_dt),
                    preferred_element_type=f32)              # (hd*h, hw)
        r_rep = jnp.tile(r, (hd, 1))                         # (hd*h, hw), r_rep[dv*h+i] = r[i]
        out_g = jnp.dot(psum_mat, (t * r_rep).astype(mxu_dt),
                        preferred_element_type=f32)          # (hd, hw)
        head_outs.append(out_g)

    attn = jnp.concatenate(head_outs, axis=0)                # (d, hw)
    v_full = jnp.concatenate(v_slabs, axis=0)                # (d, hw) == v.reshape(b, d, h, w)

    # x = attn + dp[2](v) ; return dp[3](x)  -- both fused here (no HBM round trips)
    res = jnp.dot(w2_ref[...].astype(mxu_dt), v_full.astype(mxu_dt),
                  preferred_element_type=f32) + b2_ref[...]
    z = attn + res
    out = jnp.dot(w3_ref[...].astype(mxu_dt), z.astype(mxu_dt),
                  preferred_element_type=f32) + b3_ref[...]
    o_ref[0] = out.astype(o_ref.dtype)


# ---------------------------------------------------------------------------
# Full forward pass (mirrors MatrixAttentionFunc.forward)
# ---------------------------------------------------------------------------
def matrix_attention_func_forward(x, params, weights, *, precise=False):
    nh, kd, hd, scale = params
    b, d, h, w = x.shape
    assert d == nh * hd
    hw = h * w
    cpg = 4 * kd + hd
    cproj = nh * cpg
    f32 = jnp.float32

    w1 = weights["w1"]
    b1 = weights["b1"].reshape(cproj, 1)
    w2 = weights["w2"]
    b2 = weights["b2"].reshape(d, 1)
    w3 = weights["w3"]
    b3 = weights["b3"].reshape(d, 1)

    x3 = x.reshape(b, d, hw)               # NCHW is already (channels, h*w)-contiguous

    # ---- call 1: dp[1] projection --------------------------------------------
    y = pl.pallas_call(
        functools.partial(_proj_conv_kernel, precise=precise),
        out_shape=jax.ShapeDtypeStruct((b, cproj, hw), x.dtype),
        grid=(b,),
        in_specs=[
            pl.BlockSpec((1, d, hw), lambda i: (i, 0, 0)),
            pl.BlockSpec((cproj, d), lambda i: (0, 0)),
            pl.BlockSpec((cproj, 1), lambda i: (0, 0)),
        ],
        out_specs=pl.BlockSpec((1, cproj, hw), lambda i: (i, 0, 0)),
        compiler_params=pltpu.CompilerParams(dimension_semantics=("parallel",)),
    )(x3, w1, b1)

    # Two free (contiguous-reshape) views of the projection output.
    ya = y                                 # (b, cproj, h*w)   lane-dense slabs
    yb = y.reshape(b, cproj * h, w)        # (b, cproj*h, w)   per-row slabs (rq/cq/v)

    # Small static 0/1 helper matrices, shared by every grid step.
    q = jnp.arange(hw, dtype=jnp.int32)
    tile_mat = (q[None, :] % w == jnp.arange(w, dtype=jnp.int32)[:, None]).astype(f32)    # (w, hw)
    rep_mat = (q[None, :] // w == jnp.arange(h, dtype=jnp.int32)[:, None]).astype(f32)    # (h, hw)
    a = jnp.arange(hd * h, dtype=jnp.int32)
    psum_mat = (a[None, :] // h == jnp.arange(hd, dtype=jnp.int32)[:, None]).astype(f32)  # (hd, hd*h)

    # ---- call 2: matrix attention + dp[2] residual + dp[3], fused -------------
    out = pl.pallas_call(
        functools.partial(_attn_kernel, nh=nh, kd=kd, hd=hd, h=h, w=w,
                          scale=scale, precise=precise),
        out_shape=jax.ShapeDtypeStruct((b, d, hw), x.dtype),
        grid=(b,),
        in_specs=[
            pl.BlockSpec((1, cproj, hw), lambda i: (i, 0, 0)),
            pl.BlockSpec((1, cproj * h, w), lambda i: (i, 0, 0)),
            pl.BlockSpec((w, hw), lambda i: (0, 0)),
            pl.BlockSpec((h, hw), lambda i: (0, 0)),
            pl.BlockSpec((hd, hd * h), lambda i: (0, 0)),
            pl.BlockSpec((d, d), lambda i: (0, 0)),
            pl.BlockSpec((d, 1), lambda i: (0, 0)),
            pl.BlockSpec((d, d), lambda i: (0, 0)),
            pl.BlockSpec((d, 1), lambda i: (0, 0)),
        ],
        out_specs=pl.BlockSpec((1, d, hw), lambda i: (i, 0, 0)),
        compiler_params=pltpu.CompilerParams(dimension_semantics=("parallel",)),
    )(ya, yb, tile_mat, rep_mat, psum_mat, w2, b2, w3, b3)

    return out.reshape(b, d, h, w)


# Pure-JAX reference (fp32, highest matmul precision) — correctness check only.
def _reference_forward(x, params, weights):
    nh, kd, hd, scale = params
    b, d, h, w = x.shape
    hp = jax.lax.Precision.HIGHEST

    def conv(z, wt, bias):
        return jnp.einsum("bchw,oc->bohw", z, wt, precision=hp) + bias[None, :, None, None]

    y = conv(x, weights["w1"], weights["b1"]).reshape(b, nh, 4 * kd + hd, h, w)
    rq, rk, cq, ck, v = jnp.split(y, [kd, 2 * kd, 3 * kd, 4 * kd], axis=2)
    r = jax.nn.softmax(jnp.einsum("bHdiw,bHdjw->bHijw", rq, rk, precision=hp) * scale, axis=2)
    c = jax.nn.softmax(jnp.einsum("bHdhi,bHdhj->bHihj", cq, ck, precision=hp) * scale, axis=2)
    o = jnp.einsum("bHihw,bHdij,bHjhw->bHdhw", r, v, c, precision=hp).reshape(b, d, h, w)
    o = o + conv(v.reshape(b, d, h, w), weights["w2"], weights["b2"])
    return conv(o, weights["w3"], weights["b3"])


if __name__ == "__main__":
    # params: (nh, kd, hd, scale)
    nh, kd, hd = 2, 8, 16
    scale = float(kd) ** -0.5
    params = (nh, kd, hd, scale)
    d = nh * hd                        # 32
    cproj = nh * (4 * kd + hd)         # 96

    key = jax.random.PRNGKey(0)
    k = jax.random.split(key, 7)
    weights = {
        "w1": jax.random.normal(k[0], (cproj, d), jnp.float32) * 0.08,
        "b1": jax.random.normal(k[1], (cproj,), jnp.float32) * 0.02,
        "w2": jax.random.normal(k[2], (d, d), jnp.float32) * 0.08,
        "b2": jax.random.normal(k[3], (d,), jnp.float32) * 0.02,
        "w3": jax.random.normal(k[4], (d, d), jnp.float32) * 0.08,
        "b3": jax.random.normal(k[5], (d,), jnp.float32) * 0.02,
    }

    # Main shape, plus an h != w shape to exercise the row/column index plumbing.
    for (b, h, w) in [(2, 16, 16), (2, 16, 8)]:
        x = jax.random.normal(jax.random.fold_in(k[6], h * 1000 + w),
                              (b, d, h, w), jnp.float32)
        ref = _reference_forward(x, params, weights)

        # Precise mode: all-fp32 kernel, exact softmax -> tight tolerance.
        # (Layout/indexing bugs produce O(0.1..1) errors; fp32 accumulation-order
        #  differences stay orders of magnitude below this threshold.)
        out_p = jax.block_until_ready(
            matrix_attention_func_forward(x, params, weights, precise=True))
        assert out_p.shape == (b, d, h, w)
        err_p = float(jnp.max(jnp.abs(out_p - ref)))
        assert err_p < 5e-3, ("precise-mode mismatch", b, h, w, err_p)

        # Fast mode (default): bf16 MXU operands + approximate reciprocal.
        out_f = jax.block_until_ready(
            matrix_attention_func_forward(x, params, weights, precise=False))
        err_f = float(jnp.max(jnp.abs(out_f - ref)))
        assert err_f < 3e-2, ("fast-mode mismatch", b, h, w, err_f)

    print("KERNEL_OK")
</pallas_src>

<mosaic_0001>
module attributes {stable_mosaic.version = 11 : i64} {
  func.func @_proj_conv_kernel(%arg0: i32, %arg1: memref<1x32x256xf32, #tpu.memory_space<vmem>>, %arg2: memref<96x32xf32, #tpu.memory_space<vmem>>, %arg3: memref<96x1xf32, #tpu.memory_space<vmem>>, %arg4: memref<1x96x256xf32, #tpu.memory_space<vmem>>) attributes {dimension_semantics = [#tpu.dimension_semantics<parallel>], iteration_bounds = array<i64: 2>, scalar_prefetch = 0 : i64, scratch_operands = 0 : i64, tpu.core_type = #tpu.core_type<tc>, window_params = [{transform_indices = @transform_0, window_bounds = array<i64: 1, 32, 256>}, {pipeline_mode = #tpu.pipeline_mode<synchronous>, transform_indices = @transform_1, window_bounds = array<i64: 96, 32>}, {pipeline_mode = #tpu.pipeline_mode<synchronous>, transform_indices = @transform_2, window_bounds = array<i64: 96, 1>}, {transform_indices = @transform_3, window_bounds = array<i64: 1, 96, 256>}]} {
    %c0 = arith.constant 0 : index
    %c0_0 = arith.constant 0 : index
    %0 = vector.load %arg2[%c0, %c0_0] : memref<96x32xf32, #tpu.memory_space<vmem>>, vector<96x32xf32>
    %c0_1 = arith.constant 0 : index
    %c0_2 = arith.constant 0 : index
    %c0_3 = arith.constant 0 : index
    %1 = vector.load %arg1[%c0_1, %c0_2, %c0_3] : memref<1x32x256xf32, #tpu.memory_space<vmem>>, vector<1x32x256xf32>
    %2 = vector.shape_cast %1 : vector<1x32x256xf32> to vector<32x256xf32>
    %cst = arith.constant dense<0.000000e+00> : vector<96x256xf32>
    %3 = tpu.matmul %0, %2, %cst {dimension_numbers = #tpu.dot_dimension_numbers<[1], [0], [0], [1], [0, 0, 1, 1], [], []>} : vector<96x32xf32>, vector<32x256xf32>, vector<96x256xf32> -> vector<96x256xf32>
    %c0_4 = arith.constant 0 : index
    %c0_5 = arith.constant 0 : index
    %4 = vector.load %arg3[%c0_4, %c0_5] : memref<96x1xf32, #tpu.memory_space<vmem>>, vector<96x1xf32>
    %5 = vector.broadcast %4 : vector<96x1xf32> to vector<96x256xf32>
    %6 = arith.addf %3, %5 : vector<96x256xf32>
    %c0_6 = arith.constant 0 : index
    %c0_7 = arith.constant 0 : index
    %c0_8 = arith.constant 0 : index
    %7 = vector.load %arg4[%c0_6, %c0_7, %c0_8] : memref<1x96x256xf32, #tpu.memory_space<vmem>>, vector<1x96x256xf32>
    %8 = vector.shape_cast %7 : vector<1x96x256xf32> to vector<96x256xf32>
    %9 = vector.shape_cast %6 : vector<96x256xf32> to vector<1x96x256xf32>
    tpu.vector_store %arg4[%c0_6, %c0_7, %c0_8], %9 {strides = array<i32>} : memref<1x96x256xf32, #tpu.memory_space<vmem>>, vector<1x96x256xf32>,
    return
  }
  func.func @transform_0(%arg0: i32) -> (i32, i32, i32) {
    %c0_i32 = arith.constant 0 : i32
    %c0_i32_0 = arith.constant 0 : i32
    %c0_i32_1 = arith.constant 0 : i32
    return %arg0, %c0_i32, %c0_i32_0 : i32, i32, i32
  }
  func.func @transform_1(%arg0: i32) -> (i32, i32) {
    %c0_i32 = arith.constant 0 : i32
    %c0_i32_0 = arith.constant 0 : i32
    %c0_i32_1 = arith.constant 0 : i32
    return %c0_i32, %c0_i32_0 : i32, i32
  }
  func.func @transform_2(%arg0: i32) -> (i32, i32) {
    %c0_i32 = arith.constant 0 : i32
    %c0_i32_0 = arith.constant 0 : i32
    %c0_i32_1 = arith.constant 0 : i32
    return %c0_i32, %c0_i32_0 : i32, i32
  }
  func.func @transform_3(%arg0: i32) -> (i32, i32, i32) {
    %c0_i32 = arith.constant 0 : i32
    %c0_i32_0 = arith.constant 0 : i32
    %c0_i32_1 = arith.constant 0 : i32
    return %arg0, %c0_i32, %c0_i32_0 : i32, i32, i32
  }
}

</mosaic_0001>

<bundles_post_ra>
// kernel: tpu_custom_call.1
= control target key start
LH: loop header
LB: loop body
LE: loop exit
PB: predicated region body
PF: predicated region fallthrough
CT: control target
= control target key end

     0   :  { %8 = vsyncpa [#allocation3], 0  ;;  %s943_s0 = inlined_call_operand.vmem [shape: f32[2,32,256], index: 0, kind: input, shape index: {}]   ;;  %s944_s1 = inlined_call_operand.vmem [shape: f32[96,32], index: 1, kind: input, shape index: {}]   ;;  %s945_s2 = inlined_call_operand.vmem [shape: f32[96,1], index: 2, kind: input, shape index: {}]   ;;  %s946_s3 = inlined_call_operand.hbm [shape: f32[2,96,256], index: 3, kind: output, shape index: {}]  }
   0x1   :  { %10 = vsyncpa [#allocation3 + $0x1], 0  ;;  %s705_s12 = smov 0   ;;  %s707_s13 = smov 0  }
   0x2   :  { %s709_s14 = smov 0   ;;  %s711_s15 = smov 0  }
   0x3 LB: > { %s726_s16 = sadd.s32 4294967295, %s678_s15   ;;  %s535_s17 = sadd.s32 4294967294, %s678_s15   ;;  %s678_s15 = sphi %s711_s15, %s952_s15   ;;  %s674_s14 = sphi %s709_s14, %s951_s14   ;;  %s670_s13 = sphi %s707_s13, %s950_s13   ;;  %s666_s12 = sphi %s705_s12, %s949_s12  }
   0x4   : > { %s730_s18 = sadd.s32 1, %s678_s15   ;;  %s91_s19 = sadd.s32 1, %s674_s14 }
   0x5   : > { %s88_s20 = ssub.s32 %s678_s15, %s730_s18  ;;  %p101_p0 = scmp.ne.s32.totalorder %s674_s14, %s670_s13 }
   0x6   : > { %p89_p1 = scmp.eq.s32.totalorder %s88_s20, 0  ;;  %p102_p2 = scmp.eq.s32.totalorder %s726_s16, 1 }
   0x7   : > { %p107_p3 = scmp.ne.s32.totalorder %s670_s13, %s666_s12  ;;  %p108_p4 = scmp.eq.s32.totalorder %s535_s17, 1 }
   0x8   : > { %s741_s21 = scalar_select %p89_p1, %s674_s14, %s91_s19  }
   0x9   : > { %p743_p5 = por %p102_p2, %p101_p0  ;;  %p747_p6 = por %p108_p4, %p107_p3 }
   0xa   : > { %p538_p7 = scmp.ge.s32.totalorder %s678_s15, 1  ;;  %p140_p8 = scmp.lt.s32.totalorder %s678_s15, 3 }
   0xc   : > { %p141_p9 = pnand %p538_p7, %p140_p8 }
   0xd   : > { %p164_p10 = scmp.lt.s32.totalorder (!%p141_p9), %s726_s16, 1  ;;  %v680_v0 = vmov (!%p141_p9), 0.0   ;;  %v681_v1 = vmov (!%p141_p9), 0   ;;  %v191_v2 = vld [vmem:[%s945_s2 + $0x10] sm:$0xff] (!%p141_p9)  ;;  %v189_v3 = vld [vmem:[%s945_s2] sm:$0xff] (!%p141_p9)  ;;  %v192_v15 = vld [vmem:[%s945_s2 + $0x18] sm:$0xff] (!%p141_p9) }
   0xe   : > { %144 = sbr.rel (%p141_p9) target bundleno = 286 (0x11e), region = 32  ;;  %362 = vmatprep.mubr.f32.mxu0 (!%p141_p9), %v680_v0  ;;  %398 = vmatprep.mubr.f32.mxu1 (!%p141_p9), %v680_v0  ;;  %v190_v16 = vld [vmem:[%s945_s2 + $0x8] sm:$0xff] (!%p141_p9)  ;;  %v193_v19 = vld [vmem:[%s945_s2 + $0x20] sm:$0xff] (!%p141_p9)  ;;  %vm261_vm0 = vcmask (!%p141_p9), 261120   ;;  %v175_v21 = vld [vmem:[%s944_s1 + $0x30] sm:$0xff] (!%p141_p9)  ;;  %s161_s20 = sand.u32 (!%p141_p9), 1, %s670_s13  }
   0xf   : > { %615 = vset.pattern.permute.xlu1 (!%p141_p9), %v681_v1  ;;  %614 = vset.pattern.permute.xlu0 (!%p141_p9), %v681_v1  ;;  %v194_v18 = vld [vmem:[%s945_s2 + $0x28] sm:$0xff] (!%p141_p9)  ;;  %v169_v20 = vld [vmem:[%s944_s1] sm:$0xff] (!%p141_p9)  ;;  %v196_v22 = vld [vmem:[%s945_s2 + $0x38] sm:$0xff] (!%p141_p9)  ;;  %s570_s26 = smul.u32 (!%p141_p9), 3072, %s726_s16  ;;  %s902_s30 = scalar_lea.sflag (!%p141_p9), [#allocation3], %s161_s20 }
  0x10   : > { %213 = vperm.xlu1 (!%p141_p9), %615, %v191_v2   ;;  %203 = vperm.xlu0 (!%p141_p9), %614, %v189_v3   ;;  %v195_v23 = vld [vmem:[%s945_s2 + $0x30] sm:$0xff] (!%p141_p9)  ;;  %v170_v24 = vld [vmem:[%s944_s1 + $0x8] sm:$0xff] (!%p141_p9)  ;;  %v176_v25 = vld [vmem:[%s944_s1 + $0x38] sm:$0xff] (!%p141_p9) }
  0x11   : > { %v198_v26 = vld [vmem:[%s945_s2 + $0x48] sm:$0xff] (!%p141_p9)  ;;  %v197_v27 = vld [vmem:[%s945_s2 + $0x40] sm:$0xff] (!%p141_p9)  ;;  %v171_v28 = vld [vmem:[%s944_s1 + $0x10] sm:$0xff] (!%p141_p9)  ;;  %s891_s29 = scalar_lea.hbm (!%p141_p9), %s946_s3, %s570_s26 }
  0x12   : > { %v177_v29 = vld [vmem:[%s944_s1 + $0x40] sm:$0xff] (!%p141_p9)  ;;  %v200_v30 = vld [vmem:[%s945_s2 + $0x58] sm:$0xff] (!%p141_p9)  ;;  %v199_v31 = vld [vmem:[%s945_s2 + $0x50] sm:$0xff] (!%p141_p9) }
  0x13   : > { %v172_v32 = vld [vmem:[%s944_s1 + $0x18] sm:$0xff] (!%p141_p9)  ;;  %v178_v33 = vld [vmem:[%s944_s1 + $0x48] sm:$0xff] (!%p141_p9)  ;;  %v173_v34 = vld [vmem:[%s944_s1 + $0x20] sm:$0xff] (!%p141_p9) }
  0x14   : > { %218 = vperm.xlu1 (!%p141_p9), %615, %v192_v15   ;;  %208 = vperm.xlu0 (!%p141_p9), %614, %v190_v16   ;;  %v179_v35 = vld [vmem:[%s944_s1 + $0x50] sm:$0xff] (!%p141_p9)  ;;  %v174_v36 = vld [vmem:[%s944_s1 + $0x28] sm:$0xff] (!%p141_p9)  ;;  %v180_v37 = vld [vmem:[%s944_s1 + $0x58] sm:$0xff] (!%p141_p9) }
  0x15   : > { %s165_s24 = scalar_select %p164_p10, %s726_s16, 1 }
  0x17   : > { %s556_s25 = sshll.u32 %s165_s24, 6  ;;  %s569_s24 = smul.u32 192, %s161_s20 }
  0x18   : > { %s168_s5 = scalar_lea.vmem %s943_s0, %s556_s25  ;;  %228 = vperm.xlu1 %615, %v194_v18   ;;  %223 = vperm.xlu0 %614, %v193_v19  }
  0x19   : > { %v182_v4 = vld [vmem:[%s168_s5 + $0x8] sm:$0xff]  ;;  %v184_v5 = vld [vmem:[%s168_s5 + $0x18] sm:$0xff]  ;;  %v181_v6 = vld [vmem:[%s168_s5] sm:$0xff]  ;;  %s861_s25 = scalar_lea.vmem [#allocation2], %s569_s24 }
  0x1a   : > { %v557_v7 = vpack.c.bf16 %v184_v5, %v182_v4  ;;  %v183_v8 = vld [vmem:[%s168_s5 + $0x10] sm:$0xff]  ;;  %v186_v9 = vld [vmem:[%s168_s5 + $0x28] sm:$0xff]  ;;  %v188_v10 = vld [vmem:[%s168_s5 + $0x38] sm:$0xff]  ;;  %s473_s27 = sshll.u32 %s861_s25, 4  ;;  %s893_s27 = int_to_ptr.vmem [resolvable:$true] %s473_s27 }
  0x1b   : > { %v559_v11 = vpack.c.bf16 %v183_v8, %v181_v6  ;;  %v561_v12 = vpack.c.bf16 %v188_v10, %v186_v9  ;;  %v185_v13 = vld [vmem:[%s168_s5 + $0x20] sm:$0xff]  ;;  %v187_v14 = vld [vmem:[%s168_s5 + $0x30] sm:$0xff]  ;;  %s616_s4 = scalar_lea.vmem %s893_s27, 3072  ;;  %s682_s5 = smov [#allocation2]  }
  0x1c   : > { %558 = vmatprep.subr.bf16.mxu0 %v557_v7  ;;  %565 = vmatprep.subr.bf16.mxu1 %v557_v7  ;;  %v563_v17 = vpack.c.bf16 %v187_v14, %v185_v13  ;;  %p617_p11 = scmp.ne.s32.totalorder %s893_s27, %s616_s4  ;;  %s620_s6 = sshll.u32 %s682_s5, 4  ;;  %s621_s6 = int_to_ptr.vmem [resolvable:$false] %s620_s6 }
  0x1d   : > { %560 = vmatpush1.bf16.msra.mxu0 %v559_v11  ;;  %567 = vmatpush1.bf16.msra.mxu1 %v559_v11  ;;  %s622_s7 = scalar_lea.vmem %s621_s6, 6144  ;;  %p623_p0 = scmp.lt.s32.totalorder %s893_s27, %s621_s6 }
  0x1e   : > { %562 = vmatprep.subr.bf16.mxu0 %v561_v12  ;;  %566 = vmatprep.subr.bf16.mxu1 %v561_v12  ;;  %p618_p12 = pnand %p617_p11, %p743_p5  ;;  %p624_p1 = scmp.lt.s32.totalorder %s622_s7, %s616_s4 }
  0x1f   : > { %238 = vperm.xlu1 %615, %v196_v22   ;;  %233 = vperm.xlu0 %614, %v195_v23  }
  0x20   : > { %p619_p13 = pneg %p618_p12  ;;  %p625_p2 = por %p624_p1, %p623_p0 }
  0x21   : > { %564 = vmatpush1.bf16.msra.mxu0 %v563_v17  ;;  %568 = vmatpush1.bf16.msra.mxu1 %v563_v17 }
  0x22   : > { %p626_p3 = pnand %p625_p2, %p619_p13 }
  0x23   : > { %248 = vperm.xlu1 %615, %v198_v26   ;;  %243 = vperm.xlu0 %614, %v197_v27  }
  0x24   : > { %541 = vmatmul.mubr.msk.f32.vlgmr.msra.gmra.mrb[0].mxu0 %vm261_vm0, %v169_v20  ;;  %547 = vmatmul.mubr.msk.f32.vlgmr.msra.gmra.mrb[0].mxu1 %vm261_vm0, %v175_v21 }
  0x25   : > { %368 = vmatprep.mubr.f32.mxu0 %v680_v0  ;;  %404 = vmatprep.mubr.f32.mxu1 %v680_v0 }
  0x27   : > { %258 = vperm.xlu1 %615, %v200_v30   ;;  %253 = vperm.xlu0 %614, %v199_v31  }
  0x28   : > { %542 = vmatmul.mubr.msk.f32.gmra.mrb[2].mxu0 %vm261_vm0, %v170_v24  ;;  %548 = vmatmul.mubr.msk.f32.gmra.mrb[2].mxu1 %vm261_vm0, %v176_v25 }
  0x29   : > { %374 = vmatprep.mubr.f32.mxu0 %v680_v0  ;;  %410 = vmatprep.mubr.f32.mxu1 %v680_v0 }
  0x2c   : > { %543 = vmatmul.mubr.msk.f32.gmra.mrb[4].mxu0 %vm261_vm0, %v171_v28  ;;  %549 = vmatmul.mubr.msk.f32.gmra.mrb[4].mxu1 %vm261_vm0, %v177_v29 }
  0x2d   : > { %380 = vmatprep.mubr.f32.mxu0 %v680_v0  ;;  %416 = vmatprep.mubr.f32.mxu1 %v680_v0 }
  0x30   : > { %544 = vmatmul.mubr.msk.f32.gmra.mrb[6].mxu0 %vm261_vm0, %v172_v32  ;;  %550 = vmatmul.mubr.msk.f32.gmra.mrb[6].mxu1 %vm261_vm0, %v178_v33 }
  0x31   : > { %386 = vmatprep.mubr.f32.mxu0 %v680_v0  ;;  %422 = vmatprep.mubr.f32.mxu1 %v680_v0 }
  0x34   : > { %545 = vmatmul.mubr.msk.f32.gmra.mrb[8].mxu0 %vm261_vm0, %v173_v34  ;;  %551 = vmatmul.mubr.msk.f32.gmra.mrb[8].mxu1 %vm261_vm0, %v179_v35 }
  0x35   : > { %392 = vmatprep.mubr.f32.mxu0 %v680_v0  ;;  %428 = vmatprep.mubr.f32.mxu1 %v680_v0 }
  0x38   : > { %546 = vmatmul.mubr.msk.f32.gmra.mrb[10].mxu0 %vm261_vm0, %v174_v36  ;;  %552 = vmatmul.mubr.msk.f32.gmra.mrb[10].mxu1 %vm261_vm0, %v180_v37 }
  0x8f   : > { %v204_v38 = vpop.permute.xlu0 %203  ;;  %v214_v39 = vpop.permute.xlu1 %213 }
  0x93   : > { %v209_v40 = vpop.permute.xlu0 %208  ;;  %v219_v41 = vpop.permute.xlu1 %218 }
  0x97   : > { %v854_v42 = vpop.permute.xlu0 %223  ;;  %v859_v43 = vpop.permute.xlu1 %228 }
  0x9e   : > { %v234_v44 = vpop.permute.xlu0 %233  ;;  %v239_v53 = vpop.permute.xlu1 %238 }
  0xa2   : > { %v244_v62 = vpop.permute.xlu0 %243  ;;  %v249_v7 = vpop.permute.xlu1 %248 }
  0xa6   : > { %v254_v16 = vpop.permute.xlu0 %253  ;;  %v259_v25 = vpop.permute.xlu1 %258 }
  0xf7   : > { %v364_v45 = vpop.f32.mrb[0].mxu0  ;;  %v400_v46 = vpop.f32.mrb[0].mxu1 }
  0xf8   : > { %v365_v47 = vadd.f32 %v364_v45, %v204_v38  ;;  %v401_v48 = vadd.f32 %v400_v46, %v234_v44  ;;  %v366_v49 = vpop.f32.mrb[1].mxu0  ;;  %v402_v50 = vpop.f32.mrb[1].mxu1 }
  0xf9   : > { %v367_v51 = vadd.f32 %v366_v49, %v204_v38  ;;  %v403_v52 = vadd.f32 %v402_v50, %v234_v44 }
  0xfa   : > { %435 = vst [vmem:[%s861_s25] sm:$0xff] %v365_v47  ;;  %447 = vst [vmem:[%s861_s25 + $0x60] sm:$0xff] %v401_v48 }
  0xfb   : > { %436 = vst [vmem:[%s861_s25 + $0x8] sm:$0xff] %v367_v51  ;;  %448 = vst [vmem:[%s861_s25 + $0x68] sm:$0xff] %v403_v52  ;;  %v370_v54 = vpop.f32.mrb[2].mxu0  ;;  %v406_v55 = vpop.f32.mrb[2].mxu1 }
  0xfc   : > { %v371_v56 = vadd.f32 %v370_v54, %v209_v40  ;;  %v407_v57 = vadd.f32 %v406_v55, %v239_v53  ;;  %v372_v58 = vpop.f32.mrb[3].mxu0  ;;  %v408_v59 = vpop.f32.mrb[3].mxu1 }
  0xfd   : > { %v373_v60 = vadd.f32 %v372_v58, %v209_v40  ;;  %v409_v61 = vadd.f32 %v408_v59, %v239_v53 }
  0xfe   : > { %437 = vst [vmem:[%s861_s25 + $0x10] sm:$0xff] %v371_v56  ;;  %449 = vst [vmem:[%s861_s25 + $0x70] sm:$0xff] %v407_v57 }
  0xff   : > { %438 = vst [vmem:[%s861_s25 + $0x18] sm:$0xff] %v373_v60  ;;  %450 = vst [vmem:[%s861_s25 + $0x78] sm:$0xff] %v409_v61  ;;  %v376_v63 = vpop.f32.mrb[4].mxu0  ;;  %v412_v0 = vpop.f32.mrb[4].mxu1 }
 0x100   : > { %v377_v1 = vadd.f32 %v376_v63, %v214_v39  ;;  %v413_v2 = vadd.f32 %v412_v0, %v244_v62  ;;  %v378_v3 = vpop.f32.mrb[5].mxu0  ;;  %v414_v4 = vpop.f32.mrb[5].mxu1 }
 0x101   : > { %v379_v5 = vadd.f32 %v378_v3, %v214_v39  ;;  %v415_v6 = vadd.f32 %v414_v4, %v244_v62 }
 0x102   : > { %439 = vst [vmem:[%s861_s25 + $0x20] sm:$0xff] %v377_v1  ;;  %451 = vst [vmem:[%s861_s25 + $0x80] sm:$0xff] %v413_v2 }
 0x103   : > { %440 = vst [vmem:[%s861_s25 + $0x28] sm:$0xff] %v379_v5  ;;  %452 = vst [vmem:[%s861_s25 + $0x88] sm:$0xff] %v415_v6  ;;  %v382_v8 = vpop.f32.mrb[6].mxu0  ;;  %v418_v9 = vpop.f32.mrb[6].mxu1 }
 0x104   : > { %v383_v10 = vadd.f32 %v382_v8, %v219_v41  ;;  %v419_v11 = vadd.f32 %v418_v9, %v249_v7  ;;  %v384_v12 = vpop.f32.mrb[7].mxu0  ;;  %v420_v13 = vpop.f32.mrb[7].mxu1 }
 0x105   : > { %v385_v14 = vadd.f32 %v384_v12, %v219_v41  ;;  %v421_v15 = vadd.f32 %v420_v13, %v249_v7 }
 0x106   : > { %441 = vst [vmem:[%s861_s25 + $0x30] sm:$0xff] %v383_v10  ;;  %453 = vst [vmem:[%s861_s25 + $0x90] sm:$0xff] %v419_v11 }
 0x107   : > { %442 = vst [vmem:[%s861_s25 + $0x38] sm:$0xff] %v385_v14  ;;  %454 = vst [vmem:[%s861_s25 + $0x98] sm:$0xff] %v421_v15  ;;  %v388_v17 = vpop.f32.mrb[8].mxu0  ;;  %v424_v18 = vpop.f32.mrb[8].mxu1 }
 0x108   : > { %v389_v19 = vadd.f32 %v388_v17, %v854_v42  ;;  %v425_v20 = vadd.f32 %v424_v18, %v254_v16  ;;  %v390_v21 = vpop.f32.mrb[9].mxu0  ;;  %v426_v22 = vpop.f32.mrb[9].mxu1 }
 0x109   : > { %v391_v23 = vadd.f32 %v390_v21, %v854_v42  ;;  %v427_v24 = vadd.f32 %v426_v22, %v254_v16 }
 0x10a   : > { %443 = vst [vmem:[%s861_s25 + $0x40] sm:$0xff] %v389_v19  ;;  %455 = vst [vmem:[%s861_s25 + $0xa0] sm:$0xff] %v425_v20 }
 0x10b   : > { %444 = vst [vmem:[%s861_s25 + $0x48] sm:$0xff] %v391_v23  ;;  %456 = vst [vmem:[%s861_s25 + $0xa8] sm:$0xff] %v427_v24  ;;  %v394_v26 = vpop.f32.mrb[10].mxu0  ;;  %v430_v27 = vpop.f32.mrb[10].mxu1 }
 0x10c   : > { %v395_v28 = vadd.f32 %v394_v26, %v859_v43  ;;  %v431_v29 = vadd.f32 %v430_v27, %v259_v25  ;;  %v396_v30 = vpop.f32.mrb[11].mxu0  ;;  %v432_v31 = vpop.f32.mrb[11].mxu1 }
 0x10d   : > { %v397_v32 = vadd.f32 %v396_v30, %v859_v43  ;;  %v433_v33 = vadd.f32 %v432_v31, %v259_v25 }
 0x10e   : > { %445 = vst [vmem:[%s861_s25 + $0x50] sm:$0xff] %v395_v28  ;;  %457 = vst [vmem:[%s861_s25 + $0xb0] sm:$0xff] %v431_v29 }
 0x10f   : > { %446 = vst [vmem:[%s861_s25 + $0x58] sm:$0xff] %v397_v32  ;;  %458 = vst [vmem:[%s861_s25 + $0xb8] sm:$0xff] %v433_v33 }
 0x110   : > { %629 = shalt.err (!%p626_p3)
}
 0x111   : > { %s630_s8 = scalar_lea.hbm %s891_s29, 3072  ;;  %s634_s11 = scalar_lea.hbm %s946_s3, 6144 }
 0x112   : > { %p631_p4 = scmp.ne.s32.totalorder %s891_s29, %s630_s8  ;;  %p635_p9 = scmp.lt.u32.totalorder %s891_s29, %s946_s3 }
 0x113   : > { %p636_p10 = scmp.lt.u32.totalorder %s634_s11, %s630_s8  ;;  %p638_p12 = scmp.lt.u32.totalorder %s630_s8, %s891_s29 }
 0x114   : > { %p632_p7 = pnand %p631_p4, %p743_p5 }
 0x115   : > { %p637_p11 = por %p636_p10, %p635_p9 }
 0x116   : > { %p633_p8 = pneg %p632_p7 }
 0x117   : > { %p639_p13 = por %p638_p12, %p637_p11 }
 0x119   : > { %p640_p0 = pnand %p639_p13, %p633_p8 }
 0x11b   : > { %643 = shalt.err (!%p640_p0)
}
 0x11c   : > { %s683_s20 = smov 256   ;;  %s684_s24 = smov 16  }
 0x11d   : > { %571 = dma.vmem_to_hbm [thread:$0]  (%p743_p5), %s893_s27, 3072, %s891_s29, %s902_s30, %s683_s20, %s683_s20, %s684_s24  }
 0x11e PF: > { %p577_p1 = scmp.ge.s32.totalorder %s678_s15, 2  ;;  %s488_s25 = sand.u32 1, %s666_s12  }
 0x11f   : > { %s489_s26 = scalar_lea.sflag [#allocation3], %s488_s25 }
 0x120   : > { %p574_p2 = pnand %p577_p1, %p747_p6 }
 0x122   : > { %661 = dma.done.wait (!%p574_p2), %s489_s26, 3072  }
 0x123   : > { %663 = vsyncadd (!%p574_p2), %s489_s26, 4294964224  ;;  %p13_p3 = scmp.ge.s32.totalorder %s730_s18, 4   ;;  %s949_s12 = smov %s670_s13 }
 0x124   : > { %s950_s13 = smov %s674_s14  ;;  %s951_s14 = smov %s741_s21 }
 0x125   : > { %s952_s15 = smov %s730_s18  ;;  %15 = sbr.rel (!%p13_p3) target bundleno = 3 (0x3), region = 67 }
 0x12c   :  { %494 = vsyncpa [#allocation3], 1 }
 0x12d   :  { %496 = vsyncpa [#allocation3 + $0x1], 1 }

</bundles_post_ra>
